<compile_context>
chip_gen: v7x
topology: tpu7x:2x2x1
jax: 0.10.0
libtpu: 0.0.40
codegen_flags: <defaults>
</compile_context>

<pallas_src>
import math
import functools

import jax
import jax.numpy as jnp
from jax.experimental import pallas as pl
from jax.experimental.pallas import tpu as pltpu


def _encoder_kernel(H, Dh, cd,
                    xq_ref, xf_ref, wq_ref, bq_ref, wkv_ref, bkv_ref,
                    w1_ref, b1_ref, w2_ref, b2_ref, out_ref):
    Tq, E = xq_ref.shape
    N = xf_ref.shape[0]

    # Activations cast once per tensor to the matmul dtype.
    xq = xq_ref[...].astype(cd)                                   # (Tq, E)
    xf = xf_ref[...].astype(cd)                                   # (N, E)

    # Lane-dense, full-width projections (contraction K = E). Q scale is folded
    # into the weights/bias in the wrapper. Accumulate in f32, cast result once.
    q = (jnp.dot(xq, wq_ref[...], preferred_element_type=jnp.float32)
         + bq_ref[...]).astype(cd)                                # (Tq, E)
    kv = (jnp.dot(xf, wkv_ref[...], preferred_element_type=jnp.float32)
          + bkv_ref[...]).astype(cd)                              # (N, 2E)

    b1 = b1_ref[...]                                              # (1, F) f32
    h1_acc = None
    for h in range(H):              # small static H -> fully unrolled
        lo = h * Dh
        q_h = q[:, lo:lo + Dh]                                    # (Tq, Dh)
        k_h = kv[:, lo:lo + Dh]                                   # (N, Dh)
        v_h = kv[:, E + lo:E + lo + Dh]                           # (N, Dh)

        # Scores (Tq, N): contract Dh against Dh (no K transpose materialized).
        s = jax.lax.dot_general(q_h, k_h, (((1,), (1,)), ((), ())),
                                preferred_element_type=jnp.float32)

        # Softmax over keys, kept entirely in f32; denom via EUP approx reciprocal.
        s_max = jnp.max(s, axis=-1, keepdims=True)
        p = jnp.exp(s - s_max)
        denom = jnp.sum(p, axis=-1, keepdims=True)
        p = (p * pl.reciprocal(denom, approx=True)).astype(cd)    # cast once

        # Attention values for this head: (Tq, N) x (N, Dh) -> (Tq, Dh), f32.
        av_h = jnp.dot(p, v_h, preferred_element_type=jnp.float32)

        # Head-concat fused with FFN layer 1: h1 = sum_h av[h] @ W1[h] (+ b1).
        contrib = jnp.dot(av_h.astype(cd), w1_ref[h],
                          preferred_element_type=jnp.float32)     # (Tq, F)
        h1_acc = contrib if h1_acc is None else h1_acc + contrib

    h1 = jnp.maximum(h1_acc + b1, 0.0).astype(cd)                 # (Tq, F)
    out = jnp.dot(h1, w2_ref[...], preferred_element_type=jnp.float32) + b2_ref[...]
    out_ref[...] = out.astype(out_ref.dtype)


def _pick_q_tile(N):
    for t in (256, 128):
        if N % t == 0:
            return t
    return N


def encoder_forward(emb, params, num_heads, matmul_dtype=jnp.bfloat16, q_tile=None):
    N, E = emb.shape
    assert E % num_heads == 0, "emb_dim must be divisible by num_heads"
    H = num_heads
    Dh = E // H
    F = params["w1"].shape[0]
    scale = 1.0 / math.sqrt(Dh)
    cd = matmul_dtype

    # All weight prep (transpose, head split, scale folding, dtype cast) happens in
    # the wrapper so the kernel never transposes, reshapes or re-casts weights.
    wq_t = (params["wq"].T * scale).astype(cd)                          # (E, E)
    wkv_t = jnp.concatenate([params["wk"].T, params["wv"].T], 1).astype(cd)  # (E, 2E)
    bq = (params["bq"] * scale).reshape(1, E).astype(jnp.float32)
    bkv = jnp.concatenate([params["bk"], params["bv"]]).reshape(1, 2 * E).astype(jnp.float32)
    w1_h = params["w1"].T.reshape(H, Dh, F).astype(cd)                  # (H, Dh, F)
    b1 = params["b1"].reshape(1, F).astype(jnp.float32)
    w2_t = params["w2"].T.astype(cd)                                    # (F, E)
    b2 = params["b2"].reshape(1, E).astype(jnp.float32)

    Tq = q_tile or _pick_q_tile(N)
    assert N % Tq == 0, "query tile must divide num_patches"
    nq = N // Tq

    def full(shape):
        return pl.BlockSpec(shape, lambda i, _s=shape: (0,) * len(_s))

    kernel = functools.partial(_encoder_kernel, H, Dh, cd)
    grid_spec = pltpu.PrefetchScalarGridSpec(
        num_scalar_prefetch=0,
        grid=(nq,),
        in_specs=[
            pl.BlockSpec((Tq, E), lambda i: (i, 0)),   # query rows (tiled)
            full((N, E)),                              # all rows for K/V (resident)
            full((E, E)), full((1, E)),                # Wq (scaled), bq (scaled)
            full((E, 2 * E)), full((1, 2 * E)),        # fused Wk|Wv, bk|bv
            full((H, Dh, F)), full((1, F)),            # head-major W1, b1
            full((F, E)), full((1, E)),                # W2^T, b2
        ],
        out_specs=pl.BlockSpec((Tq, E), lambda i: (i, 0)),
    )
    return pl.pallas_call(
        kernel,
        out_shape=jax.ShapeDtypeStruct((N, E), jnp.float32),
        grid_spec=grid_spec,
        compiler_params=pltpu.CompilerParams(
            dimension_semantics=("parallel",)),
    )(emb, emb, wq_t, bq, wkv_t, bkv, w1_h, b1, w2_t, b2)


def init_params(key, emb_dim, hidden_dim_ff):
    # Deterministic synthetic init (PyTorch-Linear-like uniform bounds).
    keys = jax.random.split(key, 10)

    def lin(kw, kb, out_dim, in_dim):
        bound = 1.0 / math.sqrt(in_dim)
        w = jax.random.uniform(kw, (out_dim, in_dim), jnp.float32, -bound, bound)
        b = jax.random.uniform(kb, (out_dim,), jnp.float32, -bound, bound)
        return w, b

    wq, bq = lin(keys[0], keys[1], emb_dim, emb_dim)
    wk, bk = lin(keys[2], keys[3], emb_dim, emb_dim)
    wv, bv = lin(keys[4], keys[5], emb_dim, emb_dim)
    w1, b1 = lin(keys[6], keys[7], hidden_dim_ff, emb_dim)
    w2, b2 = lin(keys[8], keys[9], emb_dim, hidden_dim_ff)
    return {
        "wq": wq, "bq": bq, "wk": wk, "bk": bk, "wv": wv, "bv": bv,
        "w1": w1, "b1": b1, "w2": w2, "b2": b2,
        # Present in the PyTorch module but unused in forward():
        "attn_embedding_bias": jnp.zeros((emb_dim,), jnp.float32),
    }


def reference_forward(emb, params, num_heads):
    """Pure-JAX reference mirroring the PyTorch forward, for validation."""
    N, E = emb.shape
    Dh = E // num_heads
    q = (emb @ params["wq"].T + params["bq"]).reshape(N, num_heads, Dh).transpose(1, 0, 2)
    k = (emb @ params["wk"].T + params["bk"]).reshape(N, num_heads, Dh).transpose(1, 0, 2)
    v = (emb @ params["wv"].T + params["bv"]).reshape(N, num_heads, Dh).transpose(1, 0, 2)
    s = jnp.einsum("hnd,hmd->hnm", q, k) / math.sqrt(Dh)
    p = jax.nn.softmax(s, axis=-1)
    a = jnp.einsum("hnm,hmd->hnd", p, v).transpose(1, 0, 2).reshape(N, E)
    h1 = jnp.maximum(a @ params["w1"].T + params["b1"], 0.0)
    return h1 @ params["w2"].T + params["b2"]


if __name__ == "__main__":
    num_patches = 8
    emb_dim = 32
    num_heads = 4
    hidden_dim_ff = 64

    key = jax.random.PRNGKey(0)
    k_emb, k_params = jax.random.split(key)
    emb = jax.random.normal(k_emb, (num_patches, emb_dim), jnp.float32)
    params = init_params(k_params, emb_dim, hidden_dim_ff)

    ref = reference_forward(emb, params, num_heads)

    # Exact-f32 path: tight tolerance (only the approx softmax reciprocal differs).
    out_f32 = jax.block_until_ready(
        encoder_forward(emb, params, num_heads, matmul_dtype=jnp.float32))
    assert out_f32.shape == (num_patches, emb_dim)
    assert jnp.allclose(out_f32, ref, atol=2e-3, rtol=2e-3), "f32 mismatch vs reference"

    # Default (bf16 matmul operands, f32 accumulation & softmax): looser tolerance.
    out_bf16 = jax.block_until_ready(encoder_forward(emb, params, num_heads))
    assert out_bf16.shape == (num_patches, emb_dim)
    assert jnp.allclose(out_bf16, ref, atol=5e-2, rtol=5e-2), "bf16 mismatch vs reference"

    print("KERNEL_OK")
</pallas_src>

<mosaic_0001>
module attributes {stable_mosaic.version = 11 : i64} {
  func.func @_encoder_kernel(%arg0: i32, %arg1: memref<8x32xf32, #tpu.memory_space<vmem>>, %arg2: memref<8x32xf32, #tpu.memory_space<vmem>>, %arg3: memref<32x32xf32, #tpu.memory_space<vmem>>, %arg4: memref<1x32xf32, #tpu.memory_space<vmem>>, %arg5: memref<32x64xf32, #tpu.memory_space<vmem>>, %arg6: memref<1x64xf32, #tpu.memory_space<vmem>>, %arg7: memref<4x8x64xf32, #tpu.memory_space<vmem>>, %arg8: memref<1x64xf32, #tpu.memory_space<vmem>>, %arg9: memref<64x32xf32, #tpu.memory_space<vmem>>, %arg10: memref<1x32xf32, #tpu.memory_space<vmem>>, %arg11: memref<8x32xf32, #tpu.memory_space<vmem>>) attributes {dimension_semantics = [#tpu.dimension_semantics<parallel>], iteration_bounds = array<i64: 1>, scalar_prefetch = 0 : i64, scratch_operands = 0 : i64, tpu.core_type = #tpu.core_type<tc>, window_params = [{transform_indices = @transform_0, window_bounds = array<i64: 8, 32>}, {pipeline_mode = #tpu.pipeline_mode<synchronous>, transform_indices = @transform_1, window_bounds = array<i64: 8, 32>}, {pipeline_mode = #tpu.pipeline_mode<synchronous>, transform_indices = @transform_2, window_bounds = array<i64: 32, 32>}, {pipeline_mode = #tpu.pipeline_mode<synchronous>, transform_indices = @transform_3, window_bounds = array<i64: 1, 32>}, {pipeline_mode = #tpu.pipeline_mode<synchronous>, transform_indices = @transform_4, window_bounds = array<i64: 32, 64>}, {pipeline_mode = #tpu.pipeline_mode<synchronous>, transform_indices = @transform_5, window_bounds = array<i64: 1, 64>}, {pipeline_mode = #tpu.pipeline_mode<synchronous>, transform_indices = @transform_6, window_bounds = array<i64: 4, 8, 64>}, {pipeline_mode = #tpu.pipeline_mode<synchronous>, transform_indices = @transform_7, window_bounds = array<i64: 1, 64>}, {pipeline_mode = #tpu.pipeline_mode<synchronous>, transform_indices = @transform_8, window_bounds = array<i64: 64, 32>}, {pipeline_mode = #tpu.pipeline_mode<synchronous>, transform_indices = @transform_9, window_bounds = array<i64: 1, 32>}, {transform_indices = @transform_10, window_bounds = array<i64: 8, 32>}]} {
    %c0 = arith.constant 0 : index
    %c0_0 = arith.constant 0 : index
    %0 = vector.load %arg1[%c0, %c0_0] : memref<8x32xf32, #tpu.memory_space<vmem>>, vector<8x32xf32>
    %c0_1 = arith.constant 0 : index
    %c0_2 = arith.constant 0 : index
    %1 = vector.load %arg2[%c0_1, %c0_2] : memref<8x32xf32, #tpu.memory_space<vmem>>, vector<8x32xf32>
    %c0_3 = arith.constant 0 : index
    %c0_4 = arith.constant 0 : index
    %2 = vector.load %arg3[%c0_3, %c0_4] : memref<32x32xf32, #tpu.memory_space<vmem>>, vector<32x32xf32>
    %cst = arith.constant dense<0.000000e+00> : vector<8x32xf32>
    %3 = tpu.matmul %0, %2, %cst {dimension_numbers = #tpu.dot_dimension_numbers<[1], [0], [0], [1], [0, 0, 1, 1], [], []>} : vector<8x32xf32>, vector<32x32xf32>, vector<8x32xf32> -> vector<8x32xf32>
    %c0_5 = arith.constant 0 : index
    %c0_6 = arith.constant 0 : index
    %4 = vector.load %arg4[%c0_5, %c0_6] : memref<1x32xf32, #tpu.memory_space<vmem>>, vector<1x32xf32>
    %5 = vector.broadcast %4 : vector<1x32xf32> to vector<8x32xf32>
    %6 = arith.addf %3, %5 : vector<8x32xf32>
    %c0_7 = arith.constant 0 : index
    %c0_8 = arith.constant 0 : index
    %7 = vector.load %arg5[%c0_7, %c0_8] : memref<32x64xf32, #tpu.memory_space<vmem>>, vector<32x64xf32>
    %cst_9 = arith.constant dense<0.000000e+00> : vector<8x64xf32>
    %8 = tpu.matmul %1, %7, %cst_9 {dimension_numbers = #tpu.dot_dimension_numbers<[1], [0], [0], [1], [0, 0, 1, 1], [], []>} : vector<8x32xf32>, vector<32x64xf32>, vector<8x64xf32> -> vector<8x64xf32>
    %c0_10 = arith.constant 0 : index
    %c0_11 = arith.constant 0 : index
    %9 = vector.load %arg6[%c0_10, %c0_11] : memref<1x64xf32, #tpu.memory_space<vmem>>, vector<1x64xf32>
    %10 = vector.broadcast %9 : vector<1x64xf32> to vector<8x64xf32>
    %11 = arith.addf %8, %10 : vector<8x64xf32>
    %c0_12 = arith.constant 0 : index
    %c0_13 = arith.constant 0 : index
    %12 = vector.load %arg8[%c0_12, %c0_13] : memref<1x64xf32, #tpu.memory_space<vmem>>, vector<1x64xf32>
    %13 = vector.extract_strided_slice %6 {offsets = [0, 0], sizes = [8, 8], strides = [1, 1]} : vector<8x32xf32> to vector<8x8xf32>
    %14 = vector.extract_strided_slice %11 {offsets = [0, 0], sizes = [8, 8], strides = [1, 1]} : vector<8x64xf32> to vector<8x8xf32>
    %15 = vector.extract_strided_slice %11 {offsets = [0, 32], sizes = [8, 8], strides = [1, 1]} : vector<8x64xf32> to vector<8x8xf32>
    %cst_14 = arith.constant dense<0.000000e+00> : vector<8x8xf32>
    %16 = tpu.matmul %13, %14, %cst_14 {dimension_numbers = #tpu.dot_dimension_numbers<[1], [1], [0], [0], [0, 0, 1, 0], [], []>} : vector<8x8xf32>, vector<8x8xf32>, vector<8x8xf32> -> vector<8x8xf32>
    %cst_15 = arith.constant dense<0xFF800000> : vector<8xf32>
    %17 = vector.multi_reduction <maximumf>, %16, %cst_15 [1] : vector<8x8xf32> to vector<8xf32>
    %18 = vector.shape_cast %17 : vector<8xf32> to vector<8x1xf32>
    %19 = vector.broadcast %18 : vector<8x1xf32> to vector<8x8xf32>
    %20 = arith.subf %16, %19 : vector<8x8xf32>
    %21 = math.exp %20 : vector<8x8xf32>
    %cst_16 = arith.constant dense<0.000000e+00> : vector<8xf32>
    %22 = vector.multi_reduction <add>, %21, %cst_16 [1] : vector<8x8xf32> to vector<8xf32>
    %23 = vector.shape_cast %22 : vector<8xf32> to vector<8x1xf32>
    %24 = tpu.reciprocal %23 {approx = true} : vector<8x1xf32> -> vector<8x1xf32>
    %25 = vector.broadcast %24 : vector<8x1xf32> to vector<8x8xf32>
    %26 = arith.mulf %21, %25 : vector<8x8xf32>
    %cst_17 = arith.constant dense<0.000000e+00> : vector<8x8xf32>
    %27 = tpu.matmul %26, %15, %cst_17 {dimension_numbers = #tpu.dot_dimension_numbers<[1], [0], [0], [1], [0, 0, 1, 1], [], []>} : vector<8x8xf32>, vector<8x8xf32>, vector<8x8xf32> -> vector<8x8xf32>
    %c0_18 = arith.constant 0 : index
    %c0_19 = arith.constant 0 : index
    %c0_20 = arith.constant 0 : index
    %28 = vector.load %arg7[%c0_18, %c0_19, %c0_20] : memref<4x8x64xf32, #tpu.memory_space<vmem>>, vector<1x8x64xf32>
    %29 = vector.shape_cast %28 : vector<1x8x64xf32> to vector<8x64xf32>
    %cst_21 = arith.constant dense<0.000000e+00> : vector<8x64xf32>
    %30 = tpu.matmul %27, %29, %cst_21 {dimension_numbers = #tpu.dot_dimension_numbers<[1], [0], [0], [1], [0, 0, 1, 1], [], []>} : vector<8x8xf32>, vector<8x64xf32>, vector<8x64xf32> -> vector<8x64xf32>
    %31 = vector.extract_strided_slice %6 {offsets = [0, 8], sizes = [8, 8], strides = [1, 1]} : vector<8x32xf32> to vector<8x8xf32>
    %32 = vector.extract_strided_slice %11 {offsets = [0, 8], sizes = [8, 8], strides = [1, 1]} : vector<8x64xf32> to vector<8x8xf32>
    %33 = vector.extract_strided_slice %11 {offsets = [0, 40], sizes = [8, 8], strides = [1, 1]} : vector<8x64xf32> to vector<8x8xf32>
    %cst_22 = arith.constant dense<0.000000e+00> : vector<8x8xf32>
    %34 = tpu.matmul %31, %32, %cst_22 {dimension_numbers = #tpu.dot_dimension_numbers<[1], [1], [0], [0], [0, 0, 1, 0], [], []>} : vector<8x8xf32>, vector<8x8xf32>, vector<8x8xf32> -> vector<8x8xf32>
    %cst_23 = arith.constant dense<0xFF800000> : vector<8xf32>
    %35 = vector.multi_reduction <maximumf>, %34, %cst_23 [1] : vector<8x8xf32> to vector<8xf32>
    %36 = vector.shape_cast %35 : vector<8xf32> to vector<8x1xf32>
    %37 = vector.broadcast %36 : vector<8x1xf32> to vector<8x8xf32>
    %38 = arith.subf %34, %37 : vector<8x8xf32>
    %39 = math.exp %38 : vector<8x8xf32>
    %cst_24 = arith.constant dense<0.000000e+00> : vector<8xf32>
    %40 = vector.multi_reduction <add>, %39, %cst_24 [1] : vector<8x8xf32> to vector<8xf32>
    %41 = vector.shape_cast %40 : vector<8xf32> to vector<8x1xf32>
    %42 = tpu.reciprocal %41 {approx = true} : vector<8x1xf32> -> vector<8x1xf32>
    %43 = vector.broadcast %42 : vector<8x1xf32> to vector<8x8xf32>
    %44 = arith.mulf %39, %43 : vector<8x8xf32>
    %cst_25 = arith.constant dense<0.000000e+00> : vector<8x8xf32>
    %45 = tpu.matmul %44, %33, %cst_25 {dimension_numbers = #tpu.dot_dimension_numbers<[1], [0], [0], [1], [0, 0, 1, 1], [], []>} : vector<8x8xf32>, vector<8x8xf32>, vector<8x8xf32> -> vector<8x8xf32>
    %c1 = arith.constant 1 : index
    %c0_26 = arith.constant 0 : index
    %c0_27 = arith.constant 0 : index
    %46 = vector.load %arg7[%c1, %c0_26, %c0_27] : memref<4x8x64xf32, #tpu.memory_space<vmem>>, vector<1x8x64xf32>
    %47 = vector.shape_cast %46 : vector<1x8x64xf32> to vector<8x64xf32>
    %cst_28 = arith.constant dense<0.000000e+00> : vector<8x64xf32>
    %48 = tpu.matmul %45, %47, %cst_28 {dimension_numbers = #tpu.dot_dimension_numbers<[1], [0], [0], [1], [0, 0, 1, 1], [], []>} : vector<8x8xf32>, vector<8x64xf32>, vector<8x64xf32> -> vector<8x64xf32>
    %49 = arith.addf %30, %48 : vector<8x64xf32>
    %50 = vector.extract_strided_slice %6 {offsets = [0, 16], sizes = [8, 8], strides = [1, 1]} : vector<8x32xf32> to vector<8x8xf32>
    %51 = vector.extract_strided_slice %11 {offsets = [0, 16], sizes = [8, 8], strides = [1, 1]} : vector<8x64xf32> to vector<8x8xf32>
    %52 = vector.extract_strided_slice %11 {offsets = [0, 48], sizes = [8, 8], strides = [1, 1]} : vector<8x64xf32> to vector<8x8xf32>
    %cst_29 = arith.constant dense<0.000000e+00> : vector<8x8xf32>
    %53 = tpu.matmul %50, %51, %cst_29 {dimension_numbers = #tpu.dot_dimension_numbers<[1], [1], [0], [0], [0, 0, 1, 0], [], []>} : vector<8x8xf32>, vector<8x8xf32>, vector<8x8xf32> -> vector<8x8xf32>
    %cst_30 = arith.constant dense<0xFF800000> : vector<8xf32>
    %54 = vector.multi_reduction <maximumf>, %53, %cst_30 [1] : vector<8x8xf32> to vector<8xf32>
    %55 = vector.shape_cast %54 : vector<8xf32> to vector<8x1xf32>
    %56 = vector.broadcast %55 : vector<8x1xf32> to vector<8x8xf32>
    %57 = arith.subf %53, %56 : vector<8x8xf32>
    %58 = math.exp %57 : vector<8x8xf32>
    %cst_31 = arith.constant dense<0.000000e+00> : vector<8xf32>
    %59 = vector.multi_reduction <add>, %58, %cst_31 [1] : vector<8x8xf32> to vector<8xf32>
    %60 = vector.shape_cast %59 : vector<8xf32> to vector<8x1xf32>
    %61 = tpu.reciprocal %60 {approx = true} : vector<8x1xf32> -> vector<8x1xf32>
    %62 = vector.broadcast %61 : vector<8x1xf32> to vector<8x8xf32>
    %63 = arith.mulf %58, %62 : vector<8x8xf32>
    %cst_32 = arith.constant dense<0.000000e+00> : vector<8x8xf32>
    %64 = tpu.matmul %63, %52, %cst_32 {dimension_numbers = #tpu.dot_dimension_numbers<[1], [0], [0], [1], [0, 0, 1, 1], [], []>} : vector<8x8xf32>, vector<8x8xf32>, vector<8x8xf32> -> vector<8x8xf32>
    %c2 = arith.constant 2 : index
    %c0_33 = arith.constant 0 : index
    %c0_34 = arith.constant 0 : index
    %65 = vector.load %arg7[%c2, %c0_33, %c0_34] : memref<4x8x64xf32, #tpu.memory_space<vmem>>, vector<1x8x64xf32>
    %66 = vector.shape_cast %65 : vector<1x8x64xf32> to vector<8x64xf32>
    %cst_35 = arith.constant dense<0.000000e+00> : vector<8x64xf32>
    %67 = tpu.matmul %64, %66, %cst_35 {dimension_numbers = #tpu.dot_dimension_numbers<[1], [0], [0], [1], [0, 0, 1, 1], [], []>} : vector<8x8xf32>, vector<8x64xf32>, vector<8x64xf32> -> vector<8x64xf32>
    %68 = arith.addf %49, %67 : vector<8x64xf32>
    %69 = vector.extract_strided_slice %6 {offsets = [0, 24], sizes = [8, 8], strides = [1, 1]} : vector<8x32xf32> to vector<8x8xf32>
    %70 = vector.extract_strided_slice %11 {offsets = [0, 24], sizes = [8, 8], strides = [1, 1]} : vector<8x64xf32> to vector<8x8xf32>
    %71 = vector.extract_strided_slice %11 {offsets = [0, 56], sizes = [8, 8], strides = [1, 1]} : vector<8x64xf32> to vector<8x8xf32>
    %cst_36 = arith.constant dense<0.000000e+00> : vector<8x8xf32>
    %72 = tpu.matmul %69, %70, %cst_36 {dimension_numbers = #tpu.dot_dimension_numbers<[1], [1], [0], [0], [0, 0, 1, 0], [], []>} : vector<8x8xf32>, vector<8x8xf32>, vector<8x8xf32> -> vector<8x8xf32>
    %cst_37 = arith.constant dense<0xFF800000> : vector<8xf32>
    %73 = vector.multi_reduction <maximumf>, %72, %cst_37 [1] : vector<8x8xf32> to vector<8xf32>
    %74 = vector.shape_cast %73 : vector<8xf32> to vector<8x1xf32>
    %75 = vector.broadcast %74 : vector<8x1xf32> to vector<8x8xf32>
    %76 = arith.subf %72, %75 : vector<8x8xf32>
    %77 = math.exp %76 : vector<8x8xf32>
    %cst_38 = arith.constant dense<0.000000e+00> : vector<8xf32>
    %78 = vector.multi_reduction <add>, %77, %cst_38 [1] : vector<8x8xf32> to vector<8xf32>
    %79 = vector.shape_cast %78 : vector<8xf32> to vector<8x1xf32>
    %80 = tpu.reciprocal %79 {approx = true} : vector<8x1xf32> -> vector<8x1xf32>
    %81 = vector.broadcast %80 : vector<8x1xf32> to vector<8x8xf32>
    %82 = arith.mulf %77, %81 : vector<8x8xf32>
    %cst_39 = arith.constant dense<0.000000e+00> : vector<8x8xf32>
    %83 = tpu.matmul %82, %71, %cst_39 {dimension_numbers = #tpu.dot_dimension_numbers<[1], [0], [0], [1], [0, 0, 1, 1], [], []>} : vector<8x8xf32>, vector<8x8xf32>, vector<8x8xf32> -> vector<8x8xf32>
    %c3 = arith.constant 3 : index
    %c0_40 = arith.constant 0 : index
    %c0_41 = arith.constant 0 : index
    %84 = vector.load %arg7[%c3, %c0_40, %c0_41] : memref<4x8x64xf32, #tpu.memory_space<vmem>>, vector<1x8x64xf32>
    %85 = vector.shape_cast %84 : vector<1x8x64xf32> to vector<8x64xf32>
    %cst_42 = arith.constant dense<0.000000e+00> : vector<8x64xf32>
    %86 = tpu.matmul %83, %85, %cst_42 {dimension_numbers = #tpu.dot_dimension_numbers<[1], [0], [0], [1], [0, 0, 1, 1], [], []>} : vector<8x8xf32>, vector<8x64xf32>, vector<8x64xf32> -> vector<8x64xf32>
    %87 = arith.addf %68, %86 : vector<8x64xf32>
    %88 = vector.broadcast %12 : vector<1x64xf32> to vector<8x64xf32>
    %89 = arith.addf %87, %88 : vector<8x64xf32>
    %cst_43 = arith.constant 0.000000e+00 : f32
    %90 = vector.broadcast %cst_43 : f32 to vector<8x64xf32>
    %91 = arith.maximumf %89, %90 : vector<8x64xf32>
    %c0_44 = arith.constant 0 : index
    %c0_45 = arith.constant 0 : index
    %92 = vector.load %arg9[%c0_44, %c0_45] : memref<64x32xf32, #tpu.memory_space<vmem>>, vector<64x32xf32>
    %cst_46 = arith.constant dense<0.000000e+00> : vector<8x32xf32>
    %93 = tpu.matmul %91, %92, %cst_46 {dimension_numbers = #tpu.dot_dimension_numbers<[1], [0], [0], [1], [0, 0, 1, 1], [], []>} : vector<8x64xf32>, vector<64x32xf32>, vector<8x32xf32> -> vector<8x32xf32>
    %c0_47 = arith.constant 0 : index
    %c0_48 = arith.constant 0 : index
    %94 = vector.load %arg10[%c0_47, %c0_48] : memref<1x32xf32, #tpu.memory_space<vmem>>, vector<1x32xf32>
    %95 = vector.broadcast %94 : vector<1x32xf32> to vector<8x32xf32>
    %96 = arith.addf %93, %95 : vector<8x32xf32>
    %c0_49 = arith.constant 0 : index
    %c0_50 = arith.constant 0 : index
    %97 = vector.load %arg11[%c0_49, %c0_50] : memref<8x32xf32, #tpu.memory_space<vmem>>, vector<8x32xf32>
    tpu.vector_store %arg11[%c0_49, %c0_50], %96 {strides = array<i32>} : memref<8x32xf32, #tpu.memory_space<vmem>>, vector<8x32xf32>,
    return
  }
  func.func @transform_0(%arg0: i32) -> (i32, i32) {
    %c0_i32 = arith.constant 0 : i32
    %c0_i32_0 = arith.constant 0 : i32
    return %arg0, %c0_i32 : i32, i32
  }
  func.func @transform_1(%arg0: i32) -> (i32, i32) {
    %c0_i32 = arith.constant 0 : i32
    %c0_i32_0 = arith.constant 0 : i32
    %c0_i32_1 = arith.constant 0 : i32
    return %c0_i32, %c0_i32_0 : i32, i32
  }
  func.func @transform_2(%arg0: i32) -> (i32, i32) {
    %c0_i32 = arith.constant 0 : i32
    %c0_i32_0 = arith.constant 0 : i32
    %c0_i32_1 = arith.constant 0 : i32
    return %c0_i32, %c0_i32_0 : i32, i32
  }
  func.func @transform_3(%arg0: i32) -> (i32, i32) {
    %c0_i32 = arith.constant 0 : i32
    %c0_i32_0 = arith.constant 0 : i32
    %c0_i32_1 = arith.constant 0 : i32
    return %c0_i32, %c0_i32_0 : i32, i32
  }
  func.func @transform_4(%arg0: i32) -> (i32, i32) {
    %c0_i32 = arith.constant 0 : i32
    %c0_i32_0 = arith.constant 0 : i32
    %c0_i32_1 = arith.constant 0 : i32
    return %c0_i32, %c0_i32_0 : i32, i32
  }
  func.func @transform_5(%arg0: i32) -> (i32, i32) {
    %c0_i32 = arith.constant 0 : i32
    %c0_i32_0 = arith.constant 0 : i32
    %c0_i32_1 = arith.constant 0 : i32
    return %c0_i32, %c0_i32_0 : i32, i32
  }
  func.func @transform_6(%arg0: i32) -> (i32, i32, i32) {
    %c0_i32 = arith.constant 0 : i32
    %c0_i32_0 = arith.constant 0 : i32
    %c0_i32_1 = arith.constant 0 : i32
    %c0_i32_2 = arith.constant 0 : i32
    return %c0_i32, %c0_i32_0, %c0_i32_1 : i32, i32, i32
  }
  func.func @transform_7(%arg0: i32) -> (i32, i32) {
    %c0_i32 = arith.constant 0 : i32
    %c0_i32_0 = arith.constant 0 : i32
    %c0_i32_1 = arith.constant 0 : i32
    return %c0_i32, %c0_i32_0 : i32, i32
  }
  func.func @transform_8(%arg0: i32) -> (i32, i32) {
    %c0_i32 = arith.constant 0 : i32
    %c0_i32_0 = arith.constant 0 : i32
    %c0_i32_1 = arith.constant 0 : i32
    return %c0_i32, %c0_i32_0 : i32, i32
  }
  func.func @transform_9(%arg0: i32) -> (i32, i32) {
    %c0_i32 = arith.constant 0 : i32
    %c0_i32_0 = arith.constant 0 : i32
    %c0_i32_1 = arith.constant 0 : i32
    return %c0_i32, %c0_i32_0 : i32, i32
  }
  func.func @transform_10(%arg0: i32) -> (i32, i32) {
    %c0_i32 = arith.constant 0 : i32
    %c0_i32_0 = arith.constant 0 : i32
    return %arg0, %c0_i32 : i32, i32
  }
}

</mosaic_0001>

<bundles_post_ra>
// kernel: tpu_custom_call.1
= control target key start
LH: loop header
LB: loop body
LE: loop exit
PB: predicated region body
PF: predicated region fallthrough
CT: control target
= control target key end

     0   :  { %15 = vsyncpa [#allocation3], 0  ;;  %s1870_s0 = inlined_call_operand.hbm [shape: f32[8,32], index: 0, kind: input, shape index: {}]   ;;  %s1871_s1 = inlined_call_operand.hbm [shape: f32[8,32], index: 1, kind: input, shape index: {}]   ;;  %s1872_s2 = inlined_call_operand.vmem [shape: f32[32,32], index: 2, kind: input, shape index: {}]   ;;  %s1873_s3 = inlined_call_operand.vmem [shape: f32[1,32], index: 3, kind: input, shape index: {}]   ;;  %s1874_s4 = inlined_call_operand.vmem [shape: f32[32,64], index: 4, kind: input, shape index: {}]   ;;  %s1875_s5 = inlined_call_operand.vmem [shape: f32[1,64], index: 5, kind: input, shape index: {}]   ;;  %s1876_s6 = inlined_call_operand.vmem [shape: f32[4,8,64], index: 6, kind: input, shape index: {}]   ;;  %s1877_s7 = inlined_call_operand.vmem [shape: f32[1,64], index: 7, kind: input, shape index: {}]   ;;  %s1878_s8 = inlined_call_operand.vmem [shape: f32[64,32], index: 8, kind: input, shape index: {}]   ;;  %s1879_s9 = inlined_call_operand.vmem [shape: f32[1,32], index: 9, kind: input, shape index: {}]   ;;  %s1880_s10 = inlined_call_operand.hbm [shape: f32[8,32], index: 10, kind: output, shape index: {}]  }
   0x1   :  { %16 = vsyncpa [#allocation6], 0 }
   0x2   :  { %17 = vsyncpa [#allocation4], 0  ;;  %s1601_s13 = smov [#allocation2]   ;;  %s1602_s15 = smov [#allocation5]  }
   0x3   :  { %s24_s14 = sshll.u32 %s1601_s13, 4  ;;  %s34_s16 = sshll.u32 %s1602_s15, 4  ;;  %s25_s14 = int_to_ptr.vmem [resolvable:$true] %s24_s14  ;;  %s35_s16 = int_to_ptr.vmem [resolvable:$true] %s34_s16 }
   0x4   :  { %s1529_s19 = scalar_lea.hbm %s1870_s0, 128 }
   0x5   :  { %p1530_p0 = scmp.ne.s32.totalorder %s1870_s0, %s1529_s19  ;;  %p1533_p1 = scmp.lt.u32.totalorder %s1529_s19, %s1870_s0 }
   0x7   :  { %p1535_p2 = pnand %p1533_p1, %p1530_p0 }
   0x9   :  { %1538 = shalt.err (!%p1535_p2)
}
   0xa   :  { %s1539_s24 = scalar_lea.vmem %s25_s14, 128  ;;  %p1544_p4 = scmp.lt.s32.totalorder %s25_s14, %s25_s14 }
   0xb   :  { %p1540_p3 = scmp.ne.s32.totalorder %s25_s14, %s1539_s24  ;;  %p1545_p5 = scmp.lt.s32.totalorder %s1539_s24, %s1539_s24 }
   0xd   :  { %p1546_p6 = por %p1545_p5, %p1544_p4 }
   0xf   :  { %p1547_p7 = pnand %p1546_p6, %p1540_p3 }
  0x11   :  { %1550 = shalt.err (!%p1547_p7)
}
  0x12   :  { %27 = dma.hbm_to_vmem [thread:$0]  %s1870_s0, 128, %s25_s14, [#allocation3]  }
  0x13   :  { %s1551_s29 = scalar_lea.hbm %s1871_s1, 128 }
  0x14   :  { %p1552_p8 = scmp.ne.s32.totalorder %s1871_s1, %s1551_s29  ;;  %p1555_p9 = scmp.lt.u32.totalorder %s1551_s29, %s1871_s1 }
  0x16   :  { %p1557_p10 = pnand %p1555_p9, %p1552_p8 }
  0x18   :  { %1560 = shalt.err (!%p1557_p10)
}
  0x19   :  { %s1561_s15 = scalar_lea.vmem %s35_s16, 128  ;;  %p1566_p12 = scmp.lt.s32.totalorder %s35_s16, %s35_s16 }
  0x1a   :  { %p1562_p11 = scmp.ne.s32.totalorder %s35_s16, %s1561_s15  ;;  %p1567_p13 = scmp.lt.s32.totalorder %s1561_s15, %s1561_s15 }
  0x1c   :  { %p1568_p0 = por %p1567_p13, %p1566_p12 }
  0x1e   :  { %p1569_p1 = pnand %p1568_p0, %p1562_p11 }
  0x20   :  { %1572 = shalt.err (!%p1569_p1)
}
  0x21   :  { %37 = dma.hbm_to_vmem [thread:$0]  %s1871_s1, 128, %s35_s16, [#allocation6]  }
  0x22   :  { %1595 = dma.done.wait [#allocation3], 128  }
  0x23   :  { %1596 = vsyncadd [#allocation3], 4294967168 }
  0x24   :  { %1597 = dma.done.wait [#allocation6], 128  }
  0x25   :  { %1598 = vsyncadd [#allocation6], 4294967168  ;;  %v1603_v0 = vmov 0.0|0.0   ;;  %vm1604_vm0 = vmmov 0   ;;  %v1605_v1 = vmov 0.0   ;;  %v62_v2 = vld [vmem:[%s1872_s2] sm:$0xff] }
  0x26   :  { %1476 = vmatprep.subr.bf16.mxu1 %v1603_v0  ;;  %1383 = vmatprep.mubr.msk.f32.mxu1 %vm1604_vm0, %v1605_v1  ;;  %v63_v3 = vld [vmem:[%s1872_s2 + $0x8] sm:$0xff]  ;;  %v64_v4 = vld [vmem:[%s1872_s2 + $0x10] sm:$0xff]  ;;  %v65_v6 = vld [vmem:[%s1872_s2 + $0x18] sm:$0xff]  ;;  %vm73_vm1 = vcmask 261120   ;;  %vm232_vm2 = vcmask 64512   ;;  %s1606_s13 = smov 120  }
  0x27   :  { %1397 = vmatprep.subr.mxu0 %v1605_v1  ;;  %1399 = vmatprep.mubr.msk.f32.mxu0 %vm1604_vm0, %v1605_v1  ;;  %v1477_v5 = vpack.c.bf16 %v63_v3, %v62_v2  ;;  %v1480_v7 = vpack.c.bf16 %v65_v6, %v64_v4  ;;  %v147_v8 = vld [vmem:[%s1874_s4] sm:$0xff]  ;;  %v148_v9 = vld [vmem:[%s1874_s4 + $0x8] sm:$0xff]  ;;  %v149_v12 = vld [vmem:[%s1874_s4 + $0x10] sm:$0xff]  ;;  %s1609_s15 = smov 112   ;;  %s1610_s1 = smov 80   ;;  %vm1215_vm3 = vcmask 523264  }
  0x28   :  { %v60_v10 = vld [vmem:[#allocation2] sm:$0xff]  ;;  %v1483_v11 = vpack.c.bf16 %v148_v9, %v147_v8  ;;  %v150_v13 = vld [vmem:[%s1874_s4 + $0x18] sm:$0xff]  ;;  %v61_v15 = vld [vmem:[#allocation5] sm:$0xff]  ;;  %s1611_s16 = smov 104   ;;  %s1612_s21 = smov 72  }
  0x29   :  { %1478 = vmatpush3.bf16.msra.mxu1 %v1477_v5  ;;  %v1486_v14 = vpack.c.bf16 %v150_v13, %v149_v12  ;;  %v1308_v18 = vld [vmem:[%s1875_s5] ss:$0 sm:$0xff]  ;;  %s1608_s5 = smov 88   ;;  %v1316_v46 = vld [vmem:[%s1876_s6 + $0x8] sm:$0xff] }
  0x2a   :  { %1479 = vmatprep.subr.bf16.mxu1 %v1603_v0  ;;  %v1306_v20 = vld [vmem:[%s1873_s3] ss:$0 sm:$0xff]  ;;  %s1607_s3 = smov 96  }
  0x2b   :  { %v396_v51 = vld [vmem:[%s1876_s6] sm:$0xff] }
  0x2d   :  { %1481 = vmatpush3.bf16.msra.mxu1 %v1480_v7 }
  0x2e   :  { %1482 = vmatprep.subr.bf16.mxu1 %v1603_v0 }
  0x30   :  { %1384 = vmatmul.mubr.msk.f32.vlgmr.msra.gmra.mrb[0].mxu1 %vm73_vm1, %v60_v10 }
  0x31   :  { %1484 = vmatpush3.bf16.msra.mxu1 %v1483_v11  ;;  %1394 = vmatprep.mubr.msk.f32.mxu1 %vm1604_vm0, %v1605_v1 }
  0x32   :  { %1485 = vmatprep.subr.bf16.mxu1 %v1603_v0 }
  0x35   :  { %1487 = vmatpush3.bf16.msra.mxu1 %v1486_v14 }
  0x36   :  { %1402 = vmatprep.subr.mxu1 %v1605_v1 }
  0x38   :  { %1395 = vmatmul.mubr.msk.f32.vlgmr.msra.gmra.mrb[2].mxu1 %vm73_vm1, %v61_v15  ;;  %v1322_v15 = vld [vmem:[%s1876_s6 + $0x10] sm:$0xff] }
  0x39   :  { %1404 = vmatprep.mubr.msk.f32.mxu1 %vm1604_vm0, %v1605_v1 }
 0x103   :  { %v143_v16 = vpop.f32.mrb[0].mxu1 }
 0x104   :  { %v1385_v17 = vpop.f32.mrb[1].mxu1  ;;  %v1744_v23 = vadd.f32 %v1306_v20, %v143_v16 }
 0x10b   :  { %v227_v19 = vpop.f32.mrb[2].mxu1 }
 0x10c   :  { %v1739_v21 = vadd.f32 %v1308_v18, %v227_v19  ;;  %v1396_v22 = vpop.f32.mrb[3].mxu1 }
 0x10e   :  { %399 = vrot.lane.b32.xlu0 %v1739_v21, %s1606_s13  ;;  %1398 = vmatpush3.xpose.msk.msra.mxu0 %vm232_vm2, %v1739_v21 }
 0x10f   :  { %1407 = vmatprep.subr.mxu0 %v1605_v1 }
 0x111   :  { %1400 = vmatmul.mubr.msk.f32.vlgmr.msra.gmra.mrb[0].mxu0 %vm232_vm2, %v1744_v23 }
 0x112   :  { %397 = vrot.lane.b32.xlu0 %v1744_v23, %s1606_s13  ;;  %1409 = vmatprep.mubr.msk.f32.mxu0 %vm1604_vm0, %v1605_v1 }
 0x180   :  { %v400_v24 = vpop.permute.xlu0 %399 }
 0x181   :  { %1408 = vmatpush3.xpose.msk.msra.mxu0 %vm232_vm2, %v400_v24 }
 0x182   :  { %1417 = vmatprep.subr.mxu0 %v1605_v1 }
 0x184   :  { %v398_v25 = vpop.permute.xlu0 %397 }
 0x185   :  { %1410 = vmatmul.mubr.msk.f32.vlgmr.msra.gmra.mrb[2].mxu0 %vm232_vm2, %v398_v25 }
 0x186   :  { %1419 = vmatprep.mubr.msk.f32.mxu0 %vm1604_vm0, %v1605_v1  ;;  %1418 = vmatpush3.msra.mxu0 %v1316_v46 }
 0x187   :  { %1427 = vmatprep.subr.mxu0 %v1605_v1 }
 0x1e4   :  { %v305_v26 = vpop.f32.mrb[0].mxu0 }
 0x1e5   :  { %v1401_v27 = vpop.f32.mrb[1].mxu0  ;;  %v309_v28 = vsel %vm232_vm2, %v305_v26, -inf }
 0x1e6   :  { %310 = vmax.xlane.f32.xlu1 %v309_v28  ;;  %v1327_v27 = vld [vmem:[%s1876_s6 + $0x18] sm:$0xff] }
 0x258   :  { %v471_v29 = vpop.f32.mrb[2].mxu0 }
 0x259   :  { %v1411_v30 = vpop.f32.mrb[3].mxu0  ;;  %v475_v31 = vsel %vm232_vm2, %v471_v29, -inf }
 0x25a   :  { %476 = vmax.xlane.f32.xlu1 %v475_v31 }
 0x26b   :  { %320 = vrot.lane.b32.xlu1 %v1739_v21, %s1607_s3 }
 0x273   :  { %v311_v32 = vpop.xlane.xlu1 %310 }
 0x274   :  { %v312_v33 = vsub.f32 %v305_v26, %v311_v32 }
 0x276   :  { %v313_v34 = vmul.f32 1.442695, %v312_v33 }
 0x278   :  { %1513 = vpow2.f32 %v313_v34 }
 0x282   :  { %v1514_v35 = vpop.eup %1513 }
 0x283   :  { %v315_v36 = vsel %vm232_vm2, %v1514_v35, 0.0 }
 0x284   :  { %316 = vadd.xlane.f32.xlu0 %v315_v36  ;;  %v1202_v36 = vld [vmem:[%s1878_s8 + $0x10] sm:$0xff] }
 0x2e7   :  { %v477_v37 = vpop.xlane.xlu1 %476 }
 0x2e8   :  { %v478_v38 = vsub.f32 %v471_v29, %v477_v37 }
 0x2ea   :  { %v479_v39 = vmul.f32 1.442695, %v478_v38  ;;  %v1203_v38 = vld [vmem:[%s1878_s8 + $0x18] sm:$0xff] }
 0x2eb   :  { %v321_v40 = vpop.permute.xlu1 %320 }
 0x2ec   :  { %1515 = vpow2.f32 %v479_v39  ;;  %1403 = vmatpush3.msra.mxu1 %v321_v40  ;;  %v1492_v39 = vpack.c.bf16 %v1203_v38, %v1202_v36 }
 0x2ed   :  { %1412 = vmatprep.subr.mxu1 %v1605_v1 }
 0x2f6   :  { %v1516_v41 = vpop.eup %1515 }
 0x2f7   :  { %v481_v42 = vsel %vm232_vm2, %v1516_v41, 0.0 }
 0x2f8   :  { %482 = vadd.xlane.f32.xlu1 %v481_v42  ;;  %v1205_v42 = vld [vmem:[%s1878_s8 + $0x28] sm:$0xff] }
 0x309   :  { %486 = vrot.lane.b32.xlu1 %v1739_v21, %s1608_s5 }
 0x30d   :  { %712 = vrot.lane.b32.xlu1 %v1739_v21, %s1609_s15 }
 0x311   :  { %v317_v43 = vpop.xlane.xlu0 %316  ;;  %710 = vrot.lane.b32.xlu1 %v1744_v23, %s1609_s15 }
 0x312   :  { %1517 = vrcp.f32 %v317_v43 }
 0x31c   :  { %v1518_v44 = vpop.eup %1517 }
 0x31d   :  { %v319_v45 = vmul.f32 %v1518_v44, %v1514_v35  ;;  %v1201_v35 = vld [vmem:[%s1878_s8 + $0x8] sm:$0xff]  ;;  %v1206_v44 = vld [vmem:[%s1878_s8 + $0x30] sm:$0xff] }
 0x31f   :  { %1405 = vmatmul.mubr.msk.f32.vlgmr.msra.gmra.mrb[4].mxu1 %vm232_vm2, %v319_v45  ;;  %v1207_v45 = vld [vmem:[%s1878_s8 + $0x38] sm:$0xff] }
 0x320   :  { %1414 = vmatprep.mubr.msk.f32.mxu1 %vm1604_vm0, %v1605_v1  ;;  %v1498_v46 = vpack.c.bf16 %v1207_v45, %v1206_v44 }
 0x385   :  { %v483_v47 = vpop.xlane.xlu1 %482 }
 0x386   :  { %1519 = vrcp.f32 %v483_v47  ;;  %v1329_v47 = vld [vmem:[%s1877_s7] ss:$0 sm:$0xff] }
 0x389   :  { %v487_v48 = vpop.permute.xlu1 %486 }
 0x38a   :  { %1413 = vmatpush3.msra.mxu1 %v487_v48 }
 0x38b   :  { %1422 = vmatprep.subr.mxu1 %v1605_v1 }
 0x38d   :  { %v713_v54 = vpop.permute.xlu1 %712 }
 0x390   :  { %v1520_v49 = vpop.eup %1519 }
 0x391   :  { %v485_v50 = vmul.f32 %v1520_v49, %v1516_v41  ;;  %v711_v57 = vpop.permute.xlu1 %710  ;;  %v1204_v41 = vld [vmem:[%s1878_s8 + $0x20] sm:$0xff] }
 0x392   :  { %v1495_v43 = vpack.c.bf16 %v1205_v42, %v1204_v41 }
 0x393   :  { %1415 = vmatmul.mubr.msk.f32.vlgmr.msra.gmra.mrb[6].mxu1 %vm232_vm2, %v485_v50 }
 0x394   :  { %1423 = vmatpush3.msra.mxu1 %v396_v51  ;;  %1424 = vmatprep.mubr.msk.f32.mxu1 %vm1604_vm0, %v1605_v1 }
 0x395   :  { %1432 = vmatprep.subr.mxu1 %v1605_v1 }
 0x3f2   :  { %v392_v52 = vpop.f32.mrb[4].mxu1 }
 0x3f3   :  { %v1406_v53 = vpop.f32.mrb[5].mxu1  ;;  %1425 = vmatmul.mubr.msk.f32.vlgmr.msra.gmra.mrb[8].mxu1 %vm232_vm2, %v392_v52  ;;  %v1330_v52 = vld [vmem:[%s1879_s9] ss:$0 sm:$0xff] }
 0x3f4   :  { %1434 = vmatprep.mubr.msk.f32.mxu1 %vm1604_vm0, %v1605_v1 }
 0x466   :  { %v558_v55 = vpop.f32.mrb[6].mxu1 }
 0x467   :  { %v1416_v56 = vpop.f32.mrb[7].mxu1  ;;  %1420 = vmatmul.mubr.msk.f32.vlgmr.msra.gmra.mrb[4].mxu0 %vm232_vm2, %v558_v55 }
 0x468   :  { %1428 = vmatpush3.xpose.msk.msra.mxu0 %vm232_vm2, %v713_v54  ;;  %1429 = vmatprep.mubr.msk.f32.mxu0 %vm1604_vm0, %v1605_v1 }
 0x469   :  { %1437 = vmatprep.subr.mxu0 %v1605_v1 }
 0x46b   :  { %1430 = vmatmul.mubr.msk.f32.vlgmr.msra.gmra.mrb[6].mxu0 %vm232_vm2, %v711_v57 }
 0x46c   :  { %1439 = vmatprep.mubr.msk.f32.mxu0 %vm1604_vm0, %v1605_v1  ;;  %1438 = vmatpush3.msra.mxu0 %v1322_v15 }
 0x46d   :  { %1447 = vmatprep.subr.mxu0 %v1605_v1 }
 0x4c6   :  { %v706_v58 = vpop.f32.mrb[8].mxu1 }
 0x4c7   :  { %v1426_v59 = vpop.f32.mrb[9].mxu1 }
 0x53a   :  { %v633_v60 = vpop.f32.mrb[4].mxu0 }
 0x53b   :  { %v707_v61 = vadd.f32 %v706_v58, %v633_v60  ;;  %v1421_v62 = vpop.f32.mrb[5].mxu0 }
 0x53e   :  { %v784_v63 = vpop.f32.mrb[6].mxu0 }
 0x53f   :  { %v1431_v2 = vpop.f32.mrb[7].mxu0  ;;  %v788_v3 = vsel %vm232_vm2, %v784_v63, -inf }
 0x540   :  { %789 = vmax.xlane.f32.xlu0 %v788_v3 }
 0x556   :  { %799 = vrot.lane.b32.xlu0 %v1739_v21, %s1610_s1  ;;  %s1613_s1 = smov [#allocation7]  }
 0x55a   :  { %953 = vrot.lane.b32.xlu0 %v1739_v21, %s1611_s16 }
 0x55e   :  { %951 = vrot.lane.b32.xlu0 %v1744_v23, %s1611_s16  ;;  %s1296_s16 = sshll.u32 %s1613_s1, 4  ;;  %s1297_s16 = int_to_ptr.vmem [resolvable:$true] %s1296_s16 }
 0x55f   :  { %s1573_s7 = scalar_lea.vmem %s1297_s16, 128  ;;  %p1578_p3 = scmp.lt.s32.totalorder %s1297_s16, %s1297_s16 }
 0x560   :  { %p1574_p2 = scmp.ne.s32.totalorder %s1297_s16, %s1573_s7  ;;  %p1579_p4 = scmp.lt.s32.totalorder %s1573_s7, %s1573_s7 }
 0x562   :  { %p1580_p5 = por %p1579_p4, %p1578_p3 }
 0x564   :  { %p1581_p6 = pnand %p1580_p5, %p1574_p2 }
 0x5cd   :  { %v790_v4 = vpop.xlane.xlu0 %789 }
 0x5ce   :  { %v791_v5 = vsub.f32 %v784_v63, %v790_v4 }
 0x5d0   :  { %v792_v6 = vmul.f32 1.442695, %v791_v5 }
 0x5d1   :  { %v800_v7 = vpop.permute.xlu0 %799 }
 0x5d2   :  { %1521 = vpow2.f32 %v792_v6  ;;  %1433 = vmatpush3.msra.mxu1 %v800_v7 }
 0x5d3   :  { %1442 = vmatprep.subr.mxu1 %v1605_v1 }
 0x5d5   :  { %v954_v12 = vpop.permute.xlu0 %953 }
 0x5d9   :  { %v952_v14 = vpop.permute.xlu0 %951 }
 0x5dc   :  { %v1522_v8 = vpop.eup %1521 }
 0x5dd   :  { %v794_v9 = vsel %vm232_vm2, %v1522_v8, 0.0 }
 0x5de   :  { %795 = vadd.xlane.f32.xlu1 %v794_v9 }
 0x66b   :  { %v796_v10 = vpop.xlane.xlu1 %795 }
 0x66c   :  { %1523 = vrcp.f32 %v796_v10 }
 0x676   :  { %v1524_v11 = vpop.eup %1523 }
 0x677   :  { %v798_v13 = vmul.f32 %v1524_v11, %v1522_v8 }
 0x679   :  { %1435 = vmatmul.mubr.msk.f32.vlgmr.msra.gmra.mrb[10].mxu1 %vm232_vm2, %v798_v13 }
 0x67a   :  { %1443 = vmatpush3.xpose.msk.msra.mxu1 %vm232_vm2, %v954_v12  ;;  %1444 = vmatprep.mubr.msk.f32.mxu1 %vm1604_vm0, %v1605_v1 }
 0x67b   :  { %1452 = vmatprep.subr.mxu1 %v1605_v1 }
 0x67d   :  { %1445 = vmatmul.mubr.msk.f32.vlgmr.msra.gmra.mrb[12].mxu1 %vm232_vm2, %v952_v14 }
 0x67e   :  { %1454 = vmatprep.mubr.msk.f32.mxu1 %vm1604_vm0, %v1605_v1  ;;  %1453 = vmatpush3.msra.mxu1 %v1327_v27 }
 0x74c   :  { %v871_v16 = vpop.f32.mrb[10].mxu1 }
 0x74d   :  { %v1436_v17 = vpop.f32.mrb[11].mxu1  ;;  %1440 = vmatmul.mubr.msk.f32.vlgmr.msra.gmra.mrb[8].mxu0 %vm232_vm2, %v871_v16 }
 0x74e   :  { %1449 = vmatprep.mubr.msk.f32.mxu0 %vm1604_vm0, %v1605_v1 }
 0x750   :  { %v1025_v18 = vpop.f32.mrb[12].mxu1 }
 0x751   :  { %v1446_v19 = vpop.f32.mrb[13].mxu1  ;;  %v1029_v20 = vsel %vm232_vm2, %v1025_v18, -inf }
 0x752   :  { %1030 = vmax.xlane.f32.xlu0 %v1029_v20 }
 0x7df   :  { %v1031_v22 = vpop.xlane.xlu0 %1030 }
 0x7e0   :  { %v1032_v23 = vsub.f32 %v1025_v18, %v1031_v22 }
 0x7e2   :  { %v1033_v24 = vmul.f32 1.442695, %v1032_v23 }
 0x7e4   :  { %1525 = vpow2.f32 %v1033_v24 }
 0x7ee   :  { %v1526_v25 = vpop.eup %1525 }
 0x7ef   :  { %v1035_v26 = vsel %vm232_vm2, %v1526_v25, 0.0 }
 0x7f0   :  { %1036 = vadd.xlane.f32.xlu1 %v1035_v26 }
 0x801   :  { %1040 = vrot.lane.b32.xlu1 %v1739_v21, %s1612_s21  ;;  %v1200_v21 = vld [vmem:[%s1878_s8] sm:$0xff] }
 0x802   :  { %v1489_v37 = vpack.c.bf16 %v1201_v35, %v1200_v21 }
 0x820   :  { %v946_v28 = vpop.f32.mrb[8].mxu0 }
 0x821   :  { %v950_v29 = vadd.f32 %v946_v28, %v707_v61  ;;  %v1441_v30 = vpop.f32.mrb[9].mxu0 }
 0x87d   :  { %v1037_v31 = vpop.xlane.xlu1 %1036 }
 0x87e   :  { %1527 = vrcp.f32 %v1037_v31 }
 0x881   :  { %v1041_v32 = vpop.permute.xlu1 %1040 }
 0x882   :  { %1448 = vmatpush3.msra.mxu0 %v1041_v32 }
 0x883   :  { %1488 = vmatprep.subr.bf16.mxu0 %v1603_v0 }
 0x888   :  { %v1528_v33 = vpop.eup %1527 }
 0x889   :  { %v1039_v34 = vmul.f32 %v1528_v33, %v1526_v25 }
 0x88b   :  { %1450 = vmatmul.mubr.msk.f32.vlgmr.msra.gmra.mrb[10].mxu0 %vm232_vm2, %v1039_v34 }
 0x88c   :  { %1473 = vmatprep.mubr.msk.f32.mxu0 %vm1604_vm0, %v1605_v1  ;;  %1490 = vmatpush3.bf16.msra.mxu0 %v1489_v37 }
 0x88d   :  { %1491 = vmatprep.subr.bf16.mxu0 %v1603_v0 }
 0x890   :  { %1493 = vmatpush3.bf16.msra.mxu0 %v1492_v39 }
 0x891   :  { %1494 = vmatprep.subr.bf16.mxu0 %v1603_v0 }
 0x894   :  { %1496 = vmatpush3.bf16.msra.mxu0 %v1495_v43 }
 0x895   :  { %1497 = vmatprep.subr.bf16.mxu0 %v1603_v0 }
 0x898   :  { %1499 = vmatpush3.bf16.msra.mxu0 %v1498_v46 }
 0x95e   :  { %v1112_v1 = vpop.f32.mrb[10].mxu0 }
 0x95f   :  { %v1451_v40 = vpop.f32.mrb[11].mxu0  ;;  %1455 = vmatmul.mubr.msk.f32.vlgmr.msra.gmra.mrb[14].mxu1 %vm232_vm2, %v1112_v1 }
 0xa32   :  { %v1187_v48 = vpop.f32.mrb[14].mxu1 }
 0xa33   :  { %v1191_v49 = vadd.f32 %v1187_v48, %v950_v29  ;;  %v1456_v50 = vpop.f32.mrb[15].mxu1 }
 0xa35   :  { %v1198_v51 = vadd.f32 %v1329_v47, %v1191_v49 }
 0xa37   :  { %v1199_v0 = vmax.f32 %v1198_v51, 0.0 }
 0xa39   :  { %1474 = vmatmul.mubr.msk.f32.vlgmr.msra.gmra.mrb[12].mxu0 %vm1215_vm3, %v1199_v0 }
 0xb0c   :  { %v1285_v53 = vpop.f32.mrb[12].mxu0 }
 0xb0d   :  { %v1286_v54 = vadd.f32 %v1330_v52, %v1285_v53  ;;  %v1475_v55 = vpop.f32.mrb[13].mxu0 }
 0xb0f   :  { %1289 = vst.msk [vmem:[#allocation7] sm:$0xff] %vm73_vm1, %v1286_v54 }
 0xb10   :  { %1584 = shalt.err (!%p1581_p6)
}
 0xb11   :  { %s1585_s20 = scalar_lea.hbm %s1880_s10, 128 }
 0xb12   :  { %p1586_p7 = scmp.ne.s32.totalorder %s1880_s10, %s1585_s20  ;;  %p1589_p8 = scmp.lt.u32.totalorder %s1585_s20, %s1880_s10 }
 0xb14   :  { %p1591_p9 = pnand %p1589_p8, %p1586_p7 }
 0xb16   :  { %1594 = shalt.err (!%p1591_p9)
}
 0xb17   :  { %1299 = dma.vmem_to_hbm [thread:$0]  %s1297_s16, 128, %s1880_s10, [#allocation4]  }
 0xb18   :  { %1599 = dma.done.wait [#allocation4], 128  }
 0xb19   :  { %1600 = vsyncadd [#allocation4], 4294967168 }
 0xb1a   :  { %1303 = vsyncpa [#allocation3], 1 }
 0xb1b   :  { %1304 = vsyncpa [#allocation6], 1 }
 0xb1c   :  { %1305 = vsyncpa [#allocation4], 1 }

</bundles_post_ra>
